<compile_context>
chip_gen: v7x
topology: tpu7x:2x2x1
jax: 0.10.0
libtpu: 0.0.40
codegen_flags: <defaults>
</compile_context>

<pallas_src>
import functools

import jax
import jax.numpy as jnp
from jax.experimental import pallas as pl
from jax.experimental.pallas import tpu as pltpu


# ---------------------------------------------------------------------------
# VMEM sizing helpers
# ---------------------------------------------------------------------------
def _vmem_budget_bytes():
    """Generation-aware (tile_sizing_budget, vmem_limit_bytes)."""
    try:
        cap = int(pltpu.get_tpu_info().vmem_capacity_bytes)
    except Exception:
        cap = 64 * 1024 * 1024  # conservative default: v7x per-core VMEM
    # 48 MiB limit on 64 MiB parts, 96 MiB on 128 MiB parts.
    limit = min((cap * 3) // 4, cap - (8 << 20))
    limit = max(limit, 16 << 20)
    budget = limit - (4 << 20)  # headroom for compiler-internal scratch
    return budget, limit


def _choose_td(N, D, itemsize, budget_bytes):
    """Largest legal lane-tile width that fits the VMEM budget, or None."""

    def fits(td):
        # Double-buffered input + output blocks, conservative allowance for
        # in-body f32 temporaries, and the double-buffered lane-padded (N,128)
        # mask block.
        # TODO(synk): single-buffer the constant-index mask block
        # (pipeline_mode=pl.Buffered(1)) to win back N*128*4 bytes of VMEM.
        need = (N * td * (2 * itemsize + 2 * itemsize + 2 * 4)
                + 2 * N * 128 * 4)
        return need <= budget_bytes

    if D < 128:
        # Block last dim must be a multiple of 128 or equal the array dim, so
        # the only legal tile is the full feature dim.
        return D if fits(D) else None

    # TD is a multiple of 128 (ragged last tile is fine — no divisibility
    # requirement on D).  Cap at ~D/2 so the "parallel" column axis has >= 2
    # tiles and can shard across both v7x TensorCores; harmless elsewhere.
    full_tiles = D // 128
    if full_tiles >= 2:
        half = (D + 1) // 2
        preferred_max = ((half + 127) // 128) * 128
    else:
        preferred_max = 128
    td = min(preferred_max, full_tiles * 128)
    while td >= 128:
        if fits(td):
            return td
        td -= 128
    return None


# ---------------------------------------------------------------------------
# Single-pass kernel (full N reduction per column tile)
# ---------------------------------------------------------------------------
def _mask_bn_kernel(inv_msum_ref, x_ref, m_ref, o_ref, *, eps):
    inv_msum = inv_msum_ref[0]                       # SMEM scalar: 1/mask.sum()
    m = m_ref[...].astype(jnp.float32)               # (N, 1)

    # Re-read x_ref per pass (VMEM reloads are cheap; 3 vld slots/cycle)
    # instead of keeping a full-tile f32 temporary live across the body.
    mean = jnp.sum(x_ref[...].astype(jnp.float32), axis=0,
                   keepdims=True) * inv_msum          # (1, TD)

    xm = (x_ref[...].astype(jnp.float32) - mean) * m  # centered, numerically safe
    var = jnp.sum(xm * xm, axis=0, keepdims=True) * inv_msum
    inv_std = jax.lax.rsqrt(var + eps)                # (1, TD) — EUP slot

    o_ref[...] = (((x_ref[...].astype(jnp.float32) - mean) * m)
                  * inv_std).astype(o_ref.dtype)


# ---------------------------------------------------------------------------
# Two-pass N-tiled fallback (for N too large to hold a full column in VMEM)
# ---------------------------------------------------------------------------
def _mask_bn_stats_kernel(x_ref, m_ref, s1_ref, s2_ref, s3_ref, *, n_total, tn):
    """Accumulate per-column sum(x), sum(m*x), sum(m*x^2) over N tiles."""
    i = pl.program_id(1)                              # N-tile index ("arbitrary", last)

    @pl.when(i == 0)
    def _():
        s1_ref[...] = jnp.zeros_like(s1_ref)
        s2_ref[...] = jnp.zeros_like(s2_ref)
        s3_ref[...] = jnp.zeros_like(s3_ref)

    # Mask out rows of a ragged last N tile (their contents are undefined).
    rows = i * tn + jax.lax.broadcasted_iota(jnp.int32, (tn, 1), 0)
    valid = rows < n_total                            # (TN, 1) bool
    x = jnp.where(valid, x_ref[...].astype(jnp.float32), 0.0)
    m = jnp.where(valid, m_ref[...].astype(jnp.float32), 0.0)

    mx = m * x
    s1_ref[...] += jnp.sum(x, axis=0, keepdims=True)
    s2_ref[...] += jnp.sum(mx, axis=0, keepdims=True)
    s3_ref[...] += jnp.sum(mx * x, axis=0, keepdims=True)


def _mask_bn_norm_kernel(x_ref, m_ref, mean_ref, istd_ref, o_ref):
    x = x_ref[...].astype(jnp.float32)
    m = m_ref[...].astype(jnp.float32)
    o_ref[...] = ((x - mean_ref[...]) * m * istd_ref[...]).astype(o_ref.dtype)


def _mask_bn_two_pass(x, m, eps, *, budget, limit, force_tn=None):
    N, D = x.shape
    itemsize = jnp.dtype(x.dtype).itemsize

    td = D if D < 128 else min(512, (D // 128) * 128)

    if force_tn is not None:
        tn = force_tn
    else:
        per_row = td * (4 * itemsize + 2 * 4) + 2 * 128 * 4
        tn = int(min((budget // per_row) // 8 * 8, 4096))
        if tn < 8:
            raise ValueError(
                "MaskBatchNorm Pallas kernel: feature dim too wide to fit even "
                "an (8, TD) tile in VMEM.")

    d_tiles = pl.cdiv(D, td)
    n_tiles = pl.cdiv(N, tn)

    stats_shape = jax.ShapeDtypeStruct((1, D), jnp.float32)
    stat_spec = pl.BlockSpec((1, td), lambda j, i: (0, j))

    s1, s2, s3 = pl.pallas_call(
        functools.partial(_mask_bn_stats_kernel, n_total=N, tn=tn),
        out_shape=(stats_shape, stats_shape, stats_shape),
        grid_spec=pltpu.PrefetchScalarGridSpec(
            num_scalar_prefetch=0,
            grid=(d_tiles, n_tiles),
            in_specs=[
                pl.BlockSpec((tn, td), lambda j, i: (i, j)),
                pl.BlockSpec((tn, 1), lambda j, i: (i, 0)),
            ],
            out_specs=(stat_spec, stat_spec, stat_spec),
        ),
        compiler_params=pltpu.CompilerParams(
            dimension_semantics=("parallel", "arbitrary"),
            vmem_limit_bytes=limit,
        ),
    )(x, m)

    msum = jnp.sum(m)
    inv_msum = 1.0 / msum
    mean = s1 * inv_msum                              # (1, D)
    # Reformulated masked variance with f32 accumulators.  Slightly less
    # robust to catastrophic cancellation than the centered single-pass form,
    # but avoids a third full sweep over x.
    var = (s3 - 2.0 * mean * s2 + mean * mean * msum) * inv_msum
    inv_std = jax.lax.rsqrt(var + eps)                # (1, D)

    return pl.pallas_call(
        _mask_bn_norm_kernel,
        out_shape=jax.ShapeDtypeStruct((N, D), x.dtype),
        grid_spec=pltpu.PrefetchScalarGridSpec(
            num_scalar_prefetch=0,
            grid=(d_tiles, n_tiles),
            in_specs=[
                pl.BlockSpec((tn, td), lambda j, i: (i, j)),
                pl.BlockSpec((tn, 1), lambda j, i: (i, 0)),
                stat_spec,
                stat_spec,
            ],
            out_specs=pl.BlockSpec((tn, td), lambda j, i: (i, j)),
        ),
        compiler_params=pltpu.CompilerParams(
            dimension_semantics=("parallel", "parallel"),
            vmem_limit_bytes=limit,
        ),
    )(x, m, mean, inv_std)


# ---------------------------------------------------------------------------
# Public wrapper
# ---------------------------------------------------------------------------
def mask_batch_norm(tensor, mask, eps=1e-6, *, _force_two_pass=False,
                    _force_tn=None):
    """Pallas implementation of MaskBatchNorm.forward."""
    orig_shape = tensor.shape
    D = orig_shape[-1]
    x = tensor.reshape(-1, D)
    N = x.shape[0]
    m = mask.reshape(-1, 1).astype(jnp.float32)

    budget, limit = _vmem_budget_bytes()
    td = None if _force_two_pass else _choose_td(
        N, D, jnp.dtype(x.dtype).itemsize, budget)

    if td is None:
        out = _mask_bn_two_pass(x, m, eps, budget=budget, limit=limit,
                                force_tn=_force_tn)
        return out.reshape(orig_shape)

    # Hoist the mask reduction out of the kernel: identical for every column
    # tile, so compute 1/mask.sum() once and ship it as a prefetched SMEM
    # scalar.  (mask.sum()==0 yields inf/nan, matching PyTorch.)
    inv_msum = (1.0 / jnp.sum(m)).reshape(1).astype(jnp.float32)

    out = pl.pallas_call(
        functools.partial(_mask_bn_kernel, eps=eps),
        out_shape=jax.ShapeDtypeStruct((N, D), x.dtype),
        grid_spec=pltpu.PrefetchScalarGridSpec(
            num_scalar_prefetch=1,
            grid=(pl.cdiv(D, td),),
            in_specs=[
                pl.BlockSpec((N, td), lambda j, inv: (0, j)),  # x column tile
                pl.BlockSpec((N, 1), lambda j, inv: (0, 0)),   # mask (constant block)
            ],
            out_specs=pl.BlockSpec((N, td), lambda j, inv: (0, j)),
        ),
        compiler_params=pltpu.CompilerParams(
            dimension_semantics=("parallel",),
            vmem_limit_bytes=limit,
        ),
    )(inv_msum, x, m)
    return out.reshape(orig_shape)


# ---------------------------------------------------------------------------
# Reference + self-test
# ---------------------------------------------------------------------------
def _reference(tensor, mask, eps=1e-6):
    m = mask.reshape(-1)[:, None].astype(jnp.float32)
    orig_shape = tensor.shape
    x = tensor.reshape(-1, tensor.shape[-1]).astype(jnp.float32)
    mean = x.sum(axis=0) / m.sum()
    var = jnp.sum(((x - mean) * m) ** 2, axis=0) / m.sum()
    return (((x - mean) * m) / jnp.sqrt(var + eps)).reshape(orig_shape)


if __name__ == "__main__":
    key = jax.random.PRNGKey(0)
    k1, k2, k3, k4 = jax.random.split(key, 4)

    # 1) Primary single-pass path: (batch=2, seq=8, hidden=32), D < 128.
    tensor = jax.random.normal(k1, (2, 8, 32), dtype=jnp.float32)
    mask = (jax.random.uniform(k2, (2, 8)) > 0.3).astype(jnp.float32)
    out = jax.block_until_ready(mask_batch_norm(tensor, mask))
    assert out.shape == tensor.shape
    assert jnp.allclose(out, _reference(tensor, mask), atol=1e-5, rtol=1e-5)

    # 2) Ragged last column tile (D not a multiple of 128, no wrapper padding).
    tensor2 = jax.random.normal(k3, (2, 8, 200), dtype=jnp.float32)
    mask2 = (jax.random.uniform(k4, (2, 8)) > 0.3).astype(jnp.float32)
    out2 = jax.block_until_ready(mask_batch_norm(tensor2, mask2))
    assert jnp.allclose(out2, _reference(tensor2, mask2), atol=1e-5, rtol=1e-5)

    # 3) Two-pass N-tiled fallback, forced with a tiny row tile so it runs at
    #    small shapes (exercises ragged last N-tile masking).
    tensor3 = jax.random.normal(k1, (4, 5, 32), dtype=jnp.float32)
    mask3 = (jax.random.uniform(k2, (4, 5)) > 0.3).astype(jnp.float32)
    out3 = jax.block_until_ready(
        mask_batch_norm(tensor3, mask3, _force_two_pass=True, _force_tn=8))
    assert jnp.allclose(out3, _reference(tensor3, mask3), atol=1e-5, rtol=1e-5)

    print("KERNEL_OK")
</pallas_src>

<mosaic_0001>
module attributes {stable_mosaic.version = 11 : i64} {
  func.func @_mask_bn_kernel(%arg0: i32, %arg1: memref<1xf32, #tpu.memory_space<smem>>, %arg2: memref<16x32xf32, #tpu.memory_space<vmem>>, %arg3: memref<16x1xf32, #tpu.memory_space<vmem>>, %arg4: memref<16x32xf32, #tpu.memory_space<vmem>>) attributes {dimension_semantics = [#tpu.dimension_semantics<parallel>], iteration_bounds = array<i64: 1>, scalar_prefetch = 1 : i64, scratch_operands = 0 : i64, tpu.core_type = #tpu.core_type<tc>, window_params = [{transform_indices = @transform_0, window_bounds = array<i64: 16, 32>}, {pipeline_mode = #tpu.pipeline_mode<synchronous>, transform_indices = @transform_1, window_bounds = array<i64: 16, 1>}, {transform_indices = @transform_2, window_bounds = array<i64: 16, 32>}]} {
    %c0 = arith.constant 0 : index
    %0 = memref.load %arg1[%c0] : memref<1xf32, #tpu.memory_space<smem>>
    %c0_0 = arith.constant 0 : index
    %c0_1 = arith.constant 0 : index
    %1 = vector.load %arg3[%c0_0, %c0_1] : memref<16x1xf32, #tpu.memory_space<vmem>>, vector<16x1xf32>
    %c0_2 = arith.constant 0 : index
    %c0_3 = arith.constant 0 : index
    %2 = vector.load %arg2[%c0_2, %c0_3] : memref<16x32xf32, #tpu.memory_space<vmem>>, vector<16x32xf32>
    %cst = arith.constant dense<0.000000e+00> : vector<32xf32>
    %3 = vector.multi_reduction <add>, %2, %cst [0] : vector<16x32xf32> to vector<32xf32>
    %4 = vector.shape_cast %3 : vector<32xf32> to vector<1x32xf32>
    %5 = vector.broadcast %0 : f32 to vector<1x32xf32>
    %6 = arith.mulf %4, %5 : vector<1x32xf32>
    %c0_4 = arith.constant 0 : index
    %c0_5 = arith.constant 0 : index
    %7 = vector.load %arg2[%c0_4, %c0_5] : memref<16x32xf32, #tpu.memory_space<vmem>>, vector<16x32xf32>
    %8 = vector.broadcast %6 : vector<1x32xf32> to vector<16x32xf32>
    %9 = arith.subf %7, %8 : vector<16x32xf32>
    %10 = vector.broadcast %1 : vector<16x1xf32> to vector<16x32xf32>
    %11 = arith.mulf %9, %10 : vector<16x32xf32>
    %12 = arith.mulf %11, %11 : vector<16x32xf32>
    %cst_6 = arith.constant dense<0.000000e+00> : vector<32xf32>
    %13 = vector.multi_reduction <add>, %12, %cst_6 [0] : vector<16x32xf32> to vector<32xf32>
    %14 = vector.shape_cast %13 : vector<32xf32> to vector<1x32xf32>
    %15 = vector.broadcast %0 : f32 to vector<1x32xf32>
    %16 = arith.mulf %14, %15 : vector<1x32xf32>
    %cst_7 = arith.constant 9.99999997E-7 : f32
    %17 = vector.broadcast %cst_7 : f32 to vector<1x32xf32>
    %18 = arith.addf %16, %17 : vector<1x32xf32>
    %19 = math.rsqrt %18 : vector<1x32xf32>
    %c0_8 = arith.constant 0 : index
    %c0_9 = arith.constant 0 : index
    %20 = vector.load %arg2[%c0_8, %c0_9] : memref<16x32xf32, #tpu.memory_space<vmem>>, vector<16x32xf32>
    %21 = vector.broadcast %6 : vector<1x32xf32> to vector<16x32xf32>
    %22 = arith.subf %20, %21 : vector<16x32xf32>
    %23 = vector.broadcast %1 : vector<16x1xf32> to vector<16x32xf32>
    %24 = arith.mulf %22, %23 : vector<16x32xf32>
    %25 = vector.broadcast %19 : vector<1x32xf32> to vector<16x32xf32>
    %26 = arith.mulf %24, %25 : vector<16x32xf32>
    %c0_10 = arith.constant 0 : index
    %c0_11 = arith.constant 0 : index
    %27 = vector.load %arg4[%c0_10, %c0_11] : memref<16x32xf32, #tpu.memory_space<vmem>>, vector<16x32xf32>
    tpu.vector_store %arg4[%c0_10, %c0_11], %26 {strides = array<i32>} : memref<16x32xf32, #tpu.memory_space<vmem>>, vector<16x32xf32>,
    return
  }
  func.func @transform_0(%arg0: i32, %arg1: memref<1xf32, #tpu.memory_space<smem>>) -> (i32, i32) {
    %c0_i32 = arith.constant 0 : i32
    %c0_i32_0 = arith.constant 0 : i32
    return %c0_i32, %arg0 : i32, i32
  }
  func.func @transform_1(%arg0: i32, %arg1: memref<1xf32, #tpu.memory_space<smem>>) -> (i32, i32) {
    %c0_i32 = arith.constant 0 : i32
    %c0_i32_0 = arith.constant 0 : i32
    %c0_i32_1 = arith.constant 0 : i32
    return %c0_i32, %c0_i32_0 : i32, i32
  }
  func.func @transform_2(%arg0: i32, %arg1: memref<1xf32, #tpu.memory_space<smem>>) -> (i32, i32) {
    %c0_i32 = arith.constant 0 : i32
    %c0_i32_0 = arith.constant 0 : i32
    return %c0_i32, %arg0 : i32, i32
  }
}

</mosaic_0001>

<bundles_post_ra>
// kernel: tpu_custom_call.1
= control target key start
LH: loop header
LB: loop body
LE: loop exit
PB: predicated region body
PF: predicated region fallthrough
CT: control target
= control target key end

     0   :  { %v110_v1 = vmov 0   ;;  %s167_s0 = inlined_call_operand.<no memory space> [shape: f32[1], index: 0, kind: input, shape index: {}]   ;;  %s168_s1 = inlined_call_operand.vmem [shape: f32[16,32], index: 1, kind: input, shape index: {}]   ;;  %s169_s2 = inlined_call_operand.vmem [shape: f32[16,1], index: 2, kind: input, shape index: {}]   ;;  %s170_s3 = inlined_call_operand.hbm [shape: f32[16,32], index: 3, kind: output, shape index: {}]  }
   0x1   :  { %v15_v0 = vld [vmem:[%s169_s2] sm:$0xff]  ;;  %83 = vset.pattern.permute.xlu0 %v110_v1 }
   0x2   :  { %9 = vsyncpa [#allocation5], 0  ;;  %35 = vperm.xlu0 %83, %v15_v0   ;;  %v16_v2 = vld [vmem:[%s169_s2 + $0x8] sm:$0xff]  ;;  %v17_v3 = vld [vmem:[%s168_s1] sm:$0xff]  ;;  %vm19_vm0 = vcmask 261120   ;;  %v29_v14 = vstv %s167_s0  ;;  %s111_s0 = smov [#allocation4]  }
   0x3   :  { %v18_v4 = vld [vmem:[%s168_s1 + $0x8] sm:$0xff]  ;;  %v20_v5 = vsel %vm19_vm0, %v17_v3, 0.0  ;;  %s68_s1 = sshll.u32 %s111_s0, 4  ;;  %s69_s1 = int_to_ptr.vmem [resolvable:$true] %s68_s1 }
   0x4   :  { %v21_v6 = vsel %vm19_vm0, %v18_v4, 0.0  ;;  %s86_s21 = scalar_lea.vmem %s69_s1, 256  ;;  %p91_p1 = scmp.lt.s32.totalorder %s69_s1, %s69_s1 }
   0x5   :  { %v22_v7 = vadd.f32 %v21_v6, %v20_v5  ;;  %p87_p0 = scmp.ne.s32.totalorder %s69_s1, %s86_s21  ;;  %p92_p2 = scmp.lt.s32.totalorder %s86_s21, %s86_s21 }
   0x6   :  { %40 = vperm.xlu0 %83, %v16_v2  }
   0x7   :  { %v23_v8 = vrot.slane %v22_v7, 4  ;;  %p93_p3 = por %p92_p2, %p91_p1 }
   0x9   :  { %v24_v9 = vadd.f32 %v23_v8, %v22_v7  ;;  %p94_p4 = pnand %p93_p3, %p87_p0 }
   0xb   :  { %v25_v10 = vrot.slane %v24_v9, 2 }
   0xd   :  { %v26_v11 = vadd.f32 %v25_v10, %v24_v9 }
   0xf   :  { %v27_v12 = vrot.slane %v26_v11, 1 }
  0x11   :  { %v28_v13 = vadd.f32 %v27_v12, %v26_v11 }
  0x13   :  { %v30_v15 = vmul.f32 %v29_v14, %v28_v13 }
  0x15   :  { %v31_v16 = vsub.f32 %v17_v3, %v30_v15  ;;  %v32_v19 = vsub.f32 %v18_v4, %v30_v15 }
  0x81   :  { %v36_v17 = vpop.permute.xlu0 %35 }
  0x82   :  { %v43_v18 = vmul.f32 %v36_v17, %v31_v16 }
  0x84   :  { %v45_v21 = vmul.f32 %v43_v18, %v43_v18 }
  0x85   :  { %v41_v20 = vpop.permute.xlu0 %40 }
  0x86   :  { %v44_v22 = vmul.f32 %v41_v20, %v32_v19  ;;  %v47_v24 = vsel %vm19_vm0, %v45_v21, 0.0 }
  0x88   :  { %v46_v23 = vmul.f32 %v44_v22, %v44_v22 }
  0x8a   :  { %v48_v25 = vsel %vm19_vm0, %v46_v23, 0.0 }
  0x8b   :  { %v49_v26 = vadd.f32 %v48_v25, %v47_v24 }
  0x8d   :  { %v50_v27 = vrot.slane %v49_v26, 4 }
  0x8f   :  { %v51_v28 = vadd.f32 %v50_v27, %v49_v26 }
  0x91   :  { %v52_v29 = vrot.slane %v51_v28, 2 }
  0x93   :  { %v53_v30 = vadd.f32 %v52_v29, %v51_v28 }
  0x95   :  { %v54_v31 = vrot.slane %v53_v30, 1 }
  0x97   :  { %v55_v32 = vadd.f32 %v54_v31, %v53_v30 }
  0x99   :  { %v56_v33 = vmul.f32 %v55_v32, %v29_v14 }
  0x9b   :  { %v57_v34 = vadd.f32 1e-06, %v56_v33 }
  0x9d   :  { %84 = vrsqrt.f32 %v57_v34 }
  0xa7   :  { %v85_v35 = vpop.eup %84 }
  0xa8   :  { %v60_v36 = vmul.f32 %v85_v35, %v44_v22  ;;  %v59_v37 = vmul.f32 %v85_v35, %v43_v18 }
  0xaa   :  { %62 = vst.msk [vmem:[#allocation4 + $0x8] sm:$0xff] %vm19_vm0, %v60_v36  ;;  %61 = vst.msk [vmem:[#allocation4] sm:$0xff] %vm19_vm0, %v59_v37 }
  0xab   :  { %97 = shalt.err (!%p94_p4)
}
  0xac   :  { %s98_s24 = scalar_lea.hbm %s170_s3, 256 }
  0xad   :  { %p99_p5 = scmp.ne.s32.totalorder %s170_s3, %s98_s24  ;;  %p102_p6 = scmp.lt.u32.totalorder %s98_s24, %s170_s3 }
  0xaf   :  { %p104_p7 = pnand %p102_p6, %p99_p5 }
  0xb1   :  { %107 = shalt.err (!%p104_p7)
}
  0xb2   :  { %s112_s29 = smov 128   ;;  %s113_s30 = smov 8  }
  0xb3   :  { %74 = dma.vmem_to_hbm [thread:$0]  %s69_s1, 256, %s170_s3, [#allocation5], %s112_s29, %s112_s29, %s113_s30  }
  0xb4   :  { %108 = dma.done.wait [#allocation5], 256  }
  0xb5   :  { %109 = vsyncadd [#allocation5], 4294967040 }
  0xb6   :  { %78 = vsyncpa [#allocation5], 1 }

</bundles_post_ra>
